<compile_context>
chip_gen: v7x
topology: tpu7x:2x2x1
jax: 0.10.0
libtpu: 0.0.40
codegen_flags: <defaults>
</compile_context>

<pallas_src>
import functools

import numpy as np
import jax
import jax.numpy as jnp
from jax.experimental import pallas as pl
from jax.experimental.pallas import tpu as pltpu


# ------------------------------ Pallas kernel -------------------------------

def _leaky_mlp_gn_kernel(*refs, n_fused, true_dims, negative_slope=0.2,
                         eps=1e-5):
    """Fused MLP: [(Linear+bias) -> GroupNorm(1,C) -> LeakyReLU] * n_fused
    followed by a final Linear+bias.

    refs layout (all VMEM):
      refs[0]                 : x tile            (tm, In_p)   bf16
      refs[1 + 4*l + 0]       : W_l  (K_p, D_p)   bf16   (resident)
      refs[1 + 4*l + 1..3]    : b_l, gamma_l, beta_l  (1, D_p) f32
      refs[-3], refs[-2]      : W_out (D_p, Out_p) bf16, b_out (1, Out_p) f32
      refs[-1]                : output tile       (tm, Out_p)  f32
    """
    x_ref = refs[0]
    o_ref = refs[-1]

    h = x_ref[...]                                    # (tm, In_p) bf16
    idx = 1
    for layer in range(n_fused):
        w_ref, b_ref, g_ref, be_ref = refs[idx:idx + 4]
        idx += 4
        inv_d = 1.0 / float(true_dims[layer])         # divide by TRUE channels

        # Linear + bias (MXU, bf16 in / f32 accumulate).
        y = jnp.dot(h, w_ref[...], preferred_element_type=jnp.float32)
        y = y + b_ref[...]                            # (tm, D_p) f32

        # GroupNorm(1, C): one-pass stats (padded columns are exactly zero,
        # so sums are unaffected; only the divisor uses the true dim).
        s = jnp.sum(y, axis=-1, keepdims=True)
        ss = jnp.sum(y * y, axis=-1, keepdims=True)
        mean = s * inv_d
        var = ss * inv_d - mean * mean
        inv = jax.lax.rsqrt(var + eps)
        y = (y - mean) * (inv * g_ref[...]) + be_ref[...]

        # LeakyReLU(0.2).
        y = jnp.where(y >= 0.0, y, negative_slope * y)
        h = y.astype(jnp.bfloat16)

    # Final Linear(dim, output_dim).
    w_ref, b_ref = refs[idx], refs[idx + 1]
    out = jnp.dot(h, w_ref[...], preferred_element_type=jnp.float32)
    o_ref[...] = (out + b_ref[...]).astype(o_ref.dtype)


# --------------------------------- wrapper ----------------------------------

def _round_up(x, m):
    return (x + m - 1) // m * m


def _pick_tm(bp):
    """Batch-tile size: sublane aligned; >=2 grid steps when batch allows
    so both v7x TensorCores get work."""
    if bp <= 8:
        return bp
    for t in (512, 256, 128, 64, 32, 16, 8):
        if bp % t == 0 and bp // t >= 2:
            return t
    return bp


def leaky_mlp_groupnorm_forward(params, x):
    """params: PyTorch-layout f32 params (see init_params). x: (B, ...)."""
    B = x.shape[0]
    x2 = x.reshape(B, -1).astype(jnp.float32)
    in_dim = x2.shape[1]
    layers = params["layers"]
    w_out, b_out = params["out"]["w"], params["out"]["b"]
    out_dim = w_out.shape[0]

    # Padded sizes: lanes (last dim) to 128, batch (sublanes) to 8.
    Bp = _round_up(B, 8)
    In_p = _round_up(in_dim, 128)
    Out_p = _round_up(out_dim, 128)
    tm = _pick_tm(Bp)

    # Zero-padded, bf16 activations (MXU-native operands).
    x_pad = jnp.pad(x2, ((0, Bp - B), (0, In_p - in_dim))).astype(jnp.bfloat16)

    operands = [x_pad]
    in_specs = [pl.BlockSpec((tm, In_p), lambda i: (i, 0))]

    true_dims = []
    k_pad = In_p
    for layer in layers:
        w = layer["w"]                      # (d_out, k_true) torch layout
        d_out, k_true = w.shape
        d_pad = _round_up(d_out, 128)
        w_pad = jnp.pad(w.T, ((0, k_pad - k_true), (0, d_pad - d_out)))
        operands += [
            w_pad.astype(jnp.bfloat16),
            jnp.pad(layer["b"], (0, d_pad - d_out)).reshape(1, d_pad),
            jnp.pad(layer["g"], (0, d_pad - d_out)).reshape(1, d_pad),
            jnp.pad(layer["be"], (0, d_pad - d_out)).reshape(1, d_pad),
        ]
        in_specs += [
            pl.BlockSpec((k_pad, d_pad), lambda i: (0, 0)),   # resident weight
            pl.BlockSpec((1, d_pad), lambda i: (0, 0)),
            pl.BlockSpec((1, d_pad), lambda i: (0, 0)),
            pl.BlockSpec((1, d_pad), lambda i: (0, 0)),
        ]
        true_dims.append(d_out)
        k_pad = d_pad

    w_o_pad = jnp.pad(w_out.T, ((0, k_pad - w_out.shape[1]),
                                (0, Out_p - out_dim)))
    operands += [
        w_o_pad.astype(jnp.bfloat16),
        jnp.pad(b_out, (0, Out_p - out_dim)).reshape(1, Out_p),
    ]
    in_specs += [
        pl.BlockSpec((k_pad, Out_p), lambda i: (0, 0)),
        pl.BlockSpec((1, Out_p), lambda i: (0, 0)),
    ]

    kernel = functools.partial(
        _leaky_mlp_gn_kernel,
        n_fused=len(layers),
        true_dims=tuple(true_dims),
        negative_slope=0.2,
    )

    out_padded = pl.pallas_call(
        kernel,
        out_shape=jax.ShapeDtypeStruct((Bp, Out_p), jnp.float32),
        grid=(Bp // tm,),
        in_specs=in_specs,
        out_specs=pl.BlockSpec((tm, Out_p), lambda i: (i, 0)),
        compiler_params=pltpu.CompilerParams(
            dimension_semantics=("parallel",),
        ),
    )(*operands)

    return out_padded[:B, :out_dim]


# ------------------------------- parameters ---------------------------------

def _linear_init(key, out_f, in_f):
    bound = 1.0 / np.sqrt(in_f)
    kw, kb = jax.random.split(key)
    w = jax.random.uniform(kw, (out_f, in_f), jnp.float32, -bound, bound)
    b = jax.random.uniform(kb, (out_f,), jnp.float32, -bound, bound)
    return w, b


def init_params(key, input_dim, output_dim, dim=256, n_blk=3):
    """PyTorch-default init: Linear U(+-1/sqrt(fan_in)); GroupNorm gamma=1,beta=0."""
    n_fused = max(n_blk - 1, 1)
    keys = jax.random.split(key, n_fused + 1)
    layers = []
    in_f = input_dim
    for i in range(n_fused):
        w, b = _linear_init(keys[i], dim, in_f)
        layers.append({"w": w, "b": b,
                       "g": jnp.ones((dim,), jnp.float32),
                       "be": jnp.zeros((dim,), jnp.float32)})
        in_f = dim
    w, b = _linear_init(keys[-1], output_dim, dim)
    return {"layers": layers, "out": {"w": w, "b": b}}


# ------------------------- pure-JAX f32 reference ----------------------------

def reference_forward(params, x):
    h = x.reshape(x.shape[0], -1).astype(jnp.float32)
    for layer in params["layers"]:
        h = h @ layer["w"].T + layer["b"]
        mean = jnp.mean(h, axis=-1, keepdims=True)
        var = jnp.mean(jnp.square(h - mean), axis=-1, keepdims=True)
        h = (h - mean) / jnp.sqrt(var + 1e-5) * layer["g"] + layer["be"]
        h = jnp.where(h >= 0.0, h, 0.2 * h)
    return h @ params["out"]["w"].T + params["out"]["b"]


# ----------------------------------- main ------------------------------------

if __name__ == "__main__":
    root = jax.random.PRNGKey(0)
    k_x, k_p = jax.random.split(root)

    # Small shapes: forward flattens everything after the batch dim.
    x = jax.random.normal(k_x, (16, 3, 8, 8), jnp.float32)   # input_dim = 192
    input_dim = int(np.prod(x.shape[1:]))
    output_dim = 64
    params = init_params(k_p, input_dim=input_dim, output_dim=output_dim,
                         dim=256, n_blk=3)

    fwd = jax.jit(leaky_mlp_groupnorm_forward)
    out = jax.block_until_ready(fwd(params, x))

    assert out.shape == (16, output_dim), out.shape
    assert bool(jnp.all(jnp.isfinite(out)))

    # Correctness vs a pure-JAX float32 reference (bf16 matmul operands in the
    # kernel -> loose tolerance).
    ref = reference_forward(params, x)
    max_err = float(jnp.max(jnp.abs(out - ref)))
    assert max_err < 0.2, f"max abs diff vs reference: {max_err}"

    print("KERNEL_OK")
</pallas_src>

<mosaic_0001>
module attributes {stable_mosaic.version = 11 : i64} {
  func.func @_leaky_mlp_gn_kernel(%arg0: i32, %arg1: memref<8x256xbf16, #tpu.memory_space<vmem>>, %arg2: memref<256x256xbf16, #tpu.memory_space<vmem>>, %arg3: memref<1x256xf32, #tpu.memory_space<vmem>>, %arg4: memref<1x256xf32, #tpu.memory_space<vmem>>, %arg5: memref<1x256xf32, #tpu.memory_space<vmem>>, %arg6: memref<256x256xbf16, #tpu.memory_space<vmem>>, %arg7: memref<1x256xf32, #tpu.memory_space<vmem>>, %arg8: memref<1x256xf32, #tpu.memory_space<vmem>>, %arg9: memref<1x256xf32, #tpu.memory_space<vmem>>, %arg10: memref<256x128xbf16, #tpu.memory_space<vmem>>, %arg11: memref<1x128xf32, #tpu.memory_space<vmem>>, %arg12: memref<8x128xf32, #tpu.memory_space<vmem>>) attributes {dimension_semantics = [#tpu.dimension_semantics<parallel>], iteration_bounds = array<i64: 2>, scalar_prefetch = 0 : i64, scratch_operands = 0 : i64, tpu.core_type = #tpu.core_type<tc>, window_params = [{transform_indices = @transform_0, window_bounds = array<i64: 8, 256>}, {pipeline_mode = #tpu.pipeline_mode<synchronous>, transform_indices = @transform_1, window_bounds = array<i64: 256, 256>}, {pipeline_mode = #tpu.pipeline_mode<synchronous>, transform_indices = @transform_2, window_bounds = array<i64: 1, 256>}, {pipeline_mode = #tpu.pipeline_mode<synchronous>, transform_indices = @transform_3, window_bounds = array<i64: 1, 256>}, {pipeline_mode = #tpu.pipeline_mode<synchronous>, transform_indices = @transform_4, window_bounds = array<i64: 1, 256>}, {pipeline_mode = #tpu.pipeline_mode<synchronous>, transform_indices = @transform_5, window_bounds = array<i64: 256, 256>}, {pipeline_mode = #tpu.pipeline_mode<synchronous>, transform_indices = @transform_6, window_bounds = array<i64: 1, 256>}, {pipeline_mode = #tpu.pipeline_mode<synchronous>, transform_indices = @transform_7, window_bounds = array<i64: 1, 256>}, {pipeline_mode = #tpu.pipeline_mode<synchronous>, transform_indices = @transform_8, window_bounds = array<i64: 1, 256>}, {pipeline_mode = #tpu.pipeline_mode<synchronous>, transform_indices = @transform_9, window_bounds = array<i64: 256, 128>}, {pipeline_mode = #tpu.pipeline_mode<synchronous>, transform_indices = @transform_10, window_bounds = array<i64: 1, 128>}, {transform_indices = @transform_11, window_bounds = array<i64: 8, 128>}]} {
    %c0 = arith.constant 0 : index
    %c0_0 = arith.constant 0 : index
    %0 = vector.load %arg1[%c0, %c0_0] : memref<8x256xbf16, #tpu.memory_space<vmem>>, vector<8x256xbf16>
    %c0_1 = arith.constant 0 : index
    %c0_2 = arith.constant 0 : index
    %1 = vector.load %arg2[%c0_1, %c0_2] : memref<256x256xbf16, #tpu.memory_space<vmem>>, vector<256x256xbf16>
    %cst = arith.constant dense<0.000000e+00> : vector<8x256xf32>
    %2 = tpu.matmul %0, %1, %cst {dimension_numbers = #tpu.dot_dimension_numbers<[1], [0], [0], [1], [0, 0, 1, 1], [], []>} : vector<8x256xbf16>, vector<256x256xbf16>, vector<8x256xf32> -> vector<8x256xf32>
    %c0_3 = arith.constant 0 : index
    %c0_4 = arith.constant 0 : index
    %3 = vector.load %arg3[%c0_3, %c0_4] : memref<1x256xf32, #tpu.memory_space<vmem>>, vector<1x256xf32>
    %4 = vector.broadcast %3 : vector<1x256xf32> to vector<8x256xf32>
    %5 = arith.addf %2, %4 : vector<8x256xf32>
    %cst_5 = arith.constant dense<0.000000e+00> : vector<8xf32>
    %6 = vector.multi_reduction <add>, %5, %cst_5 [1] : vector<8x256xf32> to vector<8xf32>
    %7 = vector.shape_cast %6 : vector<8xf32> to vector<8x1xf32>
    %8 = arith.mulf %5, %5 : vector<8x256xf32>
    %cst_6 = arith.constant dense<0.000000e+00> : vector<8xf32>
    %9 = vector.multi_reduction <add>, %8, %cst_6 [1] : vector<8x256xf32> to vector<8xf32>
    %10 = vector.shape_cast %9 : vector<8xf32> to vector<8x1xf32>
    %cst_7 = arith.constant 3.906250e-03 : f32
    %11 = vector.broadcast %cst_7 : f32 to vector<8x1xf32>
    %12 = arith.mulf %7, %11 : vector<8x1xf32>
    %cst_8 = arith.constant 3.906250e-03 : f32
    %13 = vector.broadcast %cst_8 : f32 to vector<8x1xf32>
    %14 = arith.mulf %10, %13 : vector<8x1xf32>
    %15 = arith.mulf %12, %12 : vector<8x1xf32>
    %16 = arith.subf %14, %15 : vector<8x1xf32>
    %cst_9 = arith.constant 9.99999974E-6 : f32
    %17 = vector.broadcast %cst_9 : f32 to vector<8x1xf32>
    %18 = arith.addf %16, %17 : vector<8x1xf32>
    %19 = math.rsqrt %18 : vector<8x1xf32>
    %20 = vector.broadcast %12 : vector<8x1xf32> to vector<8x256xf32>
    %21 = arith.subf %5, %20 : vector<8x256xf32>
    %c0_10 = arith.constant 0 : index
    %c0_11 = arith.constant 0 : index
    %22 = vector.load %arg4[%c0_10, %c0_11] : memref<1x256xf32, #tpu.memory_space<vmem>>, vector<1x256xf32>
    %23 = vector.broadcast %19 : vector<8x1xf32> to vector<8x256xf32>
    %24 = vector.broadcast %22 : vector<1x256xf32> to vector<8x256xf32>
    %25 = arith.mulf %23, %24 : vector<8x256xf32>
    %26 = arith.mulf %21, %25 : vector<8x256xf32>
    %c0_12 = arith.constant 0 : index
    %c0_13 = arith.constant 0 : index
    %27 = vector.load %arg5[%c0_12, %c0_13] : memref<1x256xf32, #tpu.memory_space<vmem>>, vector<1x256xf32>
    %28 = vector.broadcast %27 : vector<1x256xf32> to vector<8x256xf32>
    %29 = arith.addf %26, %28 : vector<8x256xf32>
    %cst_14 = arith.constant 0.000000e+00 : f32
    %30 = vector.broadcast %cst_14 : f32 to vector<8x256xf32>
    %31 = arith.cmpf oge, %29, %30 : vector<8x256xf32>
    %cst_15 = arith.constant 2.000000e-01 : f32
    %32 = vector.broadcast %cst_15 : f32 to vector<8x256xf32>
    %33 = arith.mulf %32, %29 : vector<8x256xf32>
    %34 = arith.select %31, %29, %33 : vector<8x256xi1>, vector<8x256xf32>
    %35 = arith.truncf %34 : vector<8x256xf32> to vector<8x256xbf16>
    %c0_16 = arith.constant 0 : index
    %c0_17 = arith.constant 0 : index
    %36 = vector.load %arg6[%c0_16, %c0_17] : memref<256x256xbf16, #tpu.memory_space<vmem>>, vector<256x256xbf16>
    %cst_18 = arith.constant dense<0.000000e+00> : vector<8x256xf32>
    %37 = tpu.matmul %35, %36, %cst_18 {dimension_numbers = #tpu.dot_dimension_numbers<[1], [0], [0], [1], [0, 0, 1, 1], [], []>} : vector<8x256xbf16>, vector<256x256xbf16>, vector<8x256xf32> -> vector<8x256xf32>
    %c0_19 = arith.constant 0 : index
    %c0_20 = arith.constant 0 : index
    %38 = vector.load %arg7[%c0_19, %c0_20] : memref<1x256xf32, #tpu.memory_space<vmem>>, vector<1x256xf32>
    %39 = vector.broadcast %38 : vector<1x256xf32> to vector<8x256xf32>
    %40 = arith.addf %37, %39 : vector<8x256xf32>
    %cst_21 = arith.constant dense<0.000000e+00> : vector<8xf32>
    %41 = vector.multi_reduction <add>, %40, %cst_21 [1] : vector<8x256xf32> to vector<8xf32>
    %42 = vector.shape_cast %41 : vector<8xf32> to vector<8x1xf32>
    %43 = arith.mulf %40, %40 : vector<8x256xf32>
    %cst_22 = arith.constant dense<0.000000e+00> : vector<8xf32>
    %44 = vector.multi_reduction <add>, %43, %cst_22 [1] : vector<8x256xf32> to vector<8xf32>
    %45 = vector.shape_cast %44 : vector<8xf32> to vector<8x1xf32>
    %cst_23 = arith.constant 3.906250e-03 : f32
    %46 = vector.broadcast %cst_23 : f32 to vector<8x1xf32>
    %47 = arith.mulf %42, %46 : vector<8x1xf32>
    %cst_24 = arith.constant 3.906250e-03 : f32
    %48 = vector.broadcast %cst_24 : f32 to vector<8x1xf32>
    %49 = arith.mulf %45, %48 : vector<8x1xf32>
    %50 = arith.mulf %47, %47 : vector<8x1xf32>
    %51 = arith.subf %49, %50 : vector<8x1xf32>
    %cst_25 = arith.constant 9.99999974E-6 : f32
    %52 = vector.broadcast %cst_25 : f32 to vector<8x1xf32>
    %53 = arith.addf %51, %52 : vector<8x1xf32>
    %54 = math.rsqrt %53 : vector<8x1xf32>
    %55 = vector.broadcast %47 : vector<8x1xf32> to vector<8x256xf32>
    %56 = arith.subf %40, %55 : vector<8x256xf32>
    %c0_26 = arith.constant 0 : index
    %c0_27 = arith.constant 0 : index
    %57 = vector.load %arg8[%c0_26, %c0_27] : memref<1x256xf32, #tpu.memory_space<vmem>>, vector<1x256xf32>
    %58 = vector.broadcast %54 : vector<8x1xf32> to vector<8x256xf32>
    %59 = vector.broadcast %57 : vector<1x256xf32> to vector<8x256xf32>
    %60 = arith.mulf %58, %59 : vector<8x256xf32>
    %61 = arith.mulf %56, %60 : vector<8x256xf32>
    %c0_28 = arith.constant 0 : index
    %c0_29 = arith.constant 0 : index
    %62 = vector.load %arg9[%c0_28, %c0_29] : memref<1x256xf32, #tpu.memory_space<vmem>>, vector<1x256xf32>
    %63 = vector.broadcast %62 : vector<1x256xf32> to vector<8x256xf32>
    %64 = arith.addf %61, %63 : vector<8x256xf32>
    %cst_30 = arith.constant 0.000000e+00 : f32
    %65 = vector.broadcast %cst_30 : f32 to vector<8x256xf32>
    %66 = arith.cmpf oge, %64, %65 : vector<8x256xf32>
    %cst_31 = arith.constant 2.000000e-01 : f32
    %67 = vector.broadcast %cst_31 : f32 to vector<8x256xf32>
    %68 = arith.mulf %67, %64 : vector<8x256xf32>
    %69 = arith.select %66, %64, %68 : vector<8x256xi1>, vector<8x256xf32>
    %70 = arith.truncf %69 : vector<8x256xf32> to vector<8x256xbf16>
    %c0_32 = arith.constant 0 : index
    %c0_33 = arith.constant 0 : index
    %71 = vector.load %arg10[%c0_32, %c0_33] : memref<256x128xbf16, #tpu.memory_space<vmem>>, vector<256x128xbf16>
    %cst_34 = arith.constant dense<0.000000e+00> : vector<8x128xf32>
    %72 = tpu.matmul %70, %71, %cst_34 {dimension_numbers = #tpu.dot_dimension_numbers<[1], [0], [0], [1], [0, 0, 1, 1], [], []>} : vector<8x256xbf16>, vector<256x128xbf16>, vector<8x128xf32> -> vector<8x128xf32>
    %c0_35 = arith.constant 0 : index
    %c0_36 = arith.constant 0 : index
    %73 = vector.load %arg11[%c0_35, %c0_36] : memref<1x128xf32, #tpu.memory_space<vmem>>, vector<1x128xf32>
    %74 = vector.broadcast %73 : vector<1x128xf32> to vector<8x128xf32>
    %75 = arith.addf %72, %74 : vector<8x128xf32>
    %c0_37 = arith.constant 0 : index
    %c0_38 = arith.constant 0 : index
    %76 = vector.load %arg12[%c0_37, %c0_38] : memref<8x128xf32, #tpu.memory_space<vmem>>, vector<8x128xf32>
    tpu.vector_store %arg12[%c0_37, %c0_38], %75 {strides = array<i32>} : memref<8x128xf32, #tpu.memory_space<vmem>>, vector<8x128xf32>,
    return
  }
  func.func @transform_0(%arg0: i32) -> (i32, i32) {
    %c0_i32 = arith.constant 0 : i32
    %c0_i32_0 = arith.constant 0 : i32
    return %arg0, %c0_i32 : i32, i32
  }
  func.func @transform_1(%arg0: i32) -> (i32, i32) {
    %c0_i32 = arith.constant 0 : i32
    %c0_i32_0 = arith.constant 0 : i32
    %c0_i32_1 = arith.constant 0 : i32
    return %c0_i32, %c0_i32_0 : i32, i32
  }
  func.func @transform_2(%arg0: i32) -> (i32, i32) {
    %c0_i32 = arith.constant 0 : i32
    %c0_i32_0 = arith.constant 0 : i32
    %c0_i32_1 = arith.constant 0 : i32
    return %c0_i32, %c0_i32_0 : i32, i32
  }
  func.func @transform_3(%arg0: i32) -> (i32, i32) {
    %c0_i32 = arith.constant 0 : i32
    %c0_i32_0 = arith.constant 0 : i32
    %c0_i32_1 = arith.constant 0 : i32
    return %c0_i32, %c0_i32_0 : i32, i32
  }
  func.func @transform_4(%arg0: i32) -> (i32, i32) {
    %c0_i32 = arith.constant 0 : i32
    %c0_i32_0 = arith.constant 0 : i32
    %c0_i32_1 = arith.constant 0 : i32
    return %c0_i32, %c0_i32_0 : i32, i32
  }
  func.func @transform_5(%arg0: i32) -> (i32, i32) {
    %c0_i32 = arith.constant 0 : i32
    %c0_i32_0 = arith.constant 0 : i32
    %c0_i32_1 = arith.constant 0 : i32
    return %c0_i32, %c0_i32_0 : i32, i32
  }
  func.func @transform_6(%arg0: i32) -> (i32, i32) {
    %c0_i32 = arith.constant 0 : i32
    %c0_i32_0 = arith.constant 0 : i32
    %c0_i32_1 = arith.constant 0 : i32
    return %c0_i32, %c0_i32_0 : i32, i32
  }
  func.func @transform_7(%arg0: i32) -> (i32, i32) {
    %c0_i32 = arith.constant 0 : i32
    %c0_i32_0 = arith.constant 0 : i32
    %c0_i32_1 = arith.constant 0 : i32
    return %c0_i32, %c0_i32_0 : i32, i32
  }
  func.func @transform_8(%arg0: i32) -> (i32, i32) {
    %c0_i32 = arith.constant 0 : i32
    %c0_i32_0 = arith.constant 0 : i32
    %c0_i32_1 = arith.constant 0 : i32
    return %c0_i32, %c0_i32_0 : i32, i32
  }
  func.func @transform_9(%arg0: i32) -> (i32, i32) {
    %c0_i32 = arith.constant 0 : i32
    %c0_i32_0 = arith.constant 0 : i32
    %c0_i32_1 = arith.constant 0 : i32
    return %c0_i32, %c0_i32_0 : i32, i32
  }
  func.func @transform_10(%arg0: i32) -> (i32, i32) {
    %c0_i32 = arith.constant 0 : i32
    %c0_i32_0 = arith.constant 0 : i32
    %c0_i32_1 = arith.constant 0 : i32
    return %c0_i32, %c0_i32_0 : i32, i32
  }
  func.func @transform_11(%arg0: i32) -> (i32, i32) {
    %c0_i32 = arith.constant 0 : i32
    %c0_i32_0 = arith.constant 0 : i32
    return %arg0, %c0_i32 : i32, i32
  }
}

</mosaic_0001>

<bundles_post_ra>
// kernel: leaky_mlp_groupnorm_forward.1
= control target key start
LH: loop header
LB: loop body
LE: loop exit
PB: predicated region body
PF: predicated region fallthrough
CT: control target
= control target key end

     0   :  { %16 = vsyncpa [#allocation3], 0  ;;  %s2029_s0 = inlined_call_operand.vmem [shape: bf16[16,256], index: 0, kind: input, shape index: {}]   ;;  %s2030_s1 = inlined_call_operand.vmem [shape: bf16[256,256], index: 1, kind: input, shape index: {}]   ;;  %s2031_s2 = inlined_call_operand.vmem [shape: f32[1,256], index: 2, kind: input, shape index: {}]   ;;  %s2032_s3 = inlined_call_operand.vmem [shape: f32[1,256], index: 3, kind: input, shape index: {}]   ;;  %s2033_s4 = inlined_call_operand.vmem [shape: f32[1,256], index: 4, kind: input, shape index: {}]   ;;  %s2034_s5 = inlined_call_operand.vmem [shape: bf16[256,256], index: 5, kind: input, shape index: {}]   ;;  %s2035_s6 = inlined_call_operand.vmem [shape: f32[1,256], index: 6, kind: input, shape index: {}]   ;;  %s2036_s7 = inlined_call_operand.vmem [shape: f32[1,256], index: 7, kind: input, shape index: {}]   ;;  %s2037_s8 = inlined_call_operand.vmem [shape: f32[1,256], index: 8, kind: input, shape index: {}]   ;;  %s2038_s9 = inlined_call_operand.vmem [shape: bf16[256,128], index: 9, kind: input, shape index: {}]   ;;  %s2039_s10 = inlined_call_operand.vmem [shape: f32[1,128], index: 10, kind: input, shape index: {}]   ;;  %s2040_s11 = inlined_call_operand.hbm [shape: f32[16,128], index: 11, kind: output, shape index: {}]  }
   0x1   :  { %18 = vsyncpa [#allocation3 + $0x1], 0  ;;  %s1640_s17 = smov 0   ;;  %s1642_s18 = smov 0  }
   0x2   :  { %s1644_s19 = smov 0   ;;  %s1646_s20 = smov 0  }
   0x3 LB: > { %2044 = sst [smem:[#allocation5_spill]] %s1573_s19  ;;  %s1661_s21 = sadd.s32 4294967295, %s1577_s20   ;;  %s1577_s20 = sphi %s1646_s20, %s2049_s20   ;;  %s1573_s19 = sphi %s1644_s19, %s2051_s19   ;;  %s1569_s18 = sphi %s1642_s18, %s2053_s18   ;;  %s1565_s17 = sphi %s1640_s17, %s2052_s17  }
   0x4   : > { %s1241_s22 = sadd.s32 4294967294, %s1577_s20   ;;  %s1665_s23 = sadd.s32 1, %s1577_s20  }
   0x5   : > { %2045 = sst [smem:[#allocation6_spill]] %s1665_s23  ;;  %s267_s24 = sadd.s32 1, %s1573_s19 }
   0x6   : > { %s264_s25 = ssub.s32 %s1577_s20, %s1665_s23  ;;  %p277_p0 = scmp.ne.s32.totalorder %s1573_s19, %s1569_s18 }
   0x7   : > { %p265_p1 = scmp.eq.s32.totalorder %s264_s25, 0  ;;  %p278_p2 = scmp.eq.s32.totalorder %s1661_s21, 1 }
   0x8   : > { %p283_p3 = scmp.ne.s32.totalorder %s1569_s18, %s1565_s17  ;;  %p284_p4 = scmp.eq.s32.totalorder %s1241_s22, 1 }
   0x9   : > { %s1676_s26 = scalar_select %p265_p1, %s1573_s19, %s267_s24  }
   0xa   : > { %p1678_p5 = por %p278_p2, %p277_p0  ;;  %p1682_p6 = por %p284_p4, %p283_p3 }
   0xb   : > { %2046 = sst [smem:[#allocation7_spill]] %s1676_s26  ;;  %p1244_p7 = scmp.ge.s32.totalorder %s1577_s20, 1 }
   0xc   : > { %p340_p8 = scmp.lt.s32.totalorder %s1577_s20, 3 }
   0xe   : > { %p341_p9 = pnand %p1244_p7, %p340_p8 }
   0xf   : > { %v1397_v0 = vld [vmem:[%s2030_s1 + $0x4] ss:$8 sps:$4 sm:$0xff] (!%p341_p9)   ;;  %v1399_v1 = vld [vmem:[%s2030_s1] ss:$8 sps:$4 sm:$0xff] (!%p341_p9)   ;;  %v1400_v2 = vld [vmem:[%s2030_s1 + $0x14] ss:$8 sps:$4 sm:$0xff] (!%p341_p9)   ;;  %v421_v51 = vlaneseq (!%p341_p9) }
  0x10   : > { %344 = sbr.rel (%p341_p9) target bundleno = 1095 (0x447), region = 64  ;;  %598 = vmatprep.subr.bf16.mxu0 (!%p341_p9), %v1397_v0  ;;  %v1402_v3 = vld [vmem:[%s2030_s1 + $0x10] ss:$8 sps:$4 sm:$0xff] (!%p341_p9)   ;;  %v1403_v4 = vld [vmem:[%s2030_s1 + $0x24] ss:$8 sps:$4 sm:$0xff] (!%p341_p9)   ;;  %p380_p10 = scmp.lt.s32.totalorder (!%p341_p9), %s1661_s21, 1 }
  0x11   : > { %599 = vmatpush1.bf16.msra.mxu0 (!%p341_p9), %v1399_v1  ;;  %v1405_v5 = vld [vmem:[%s2030_s1 + $0x20] ss:$8 sps:$4 sm:$0xff] (!%p341_p9)   ;;  %v1406_v6 = vld [vmem:[%s2030_s1 + $0x34] ss:$8 sps:$4 sm:$0xff] (!%p341_p9)   ;;  %v1408_v7 = vld [vmem:[%s2030_s1 + $0x30] ss:$8 sps:$4 sm:$0xff] (!%p341_p9)  }
  0x12   : > { %600 = vmatprep.subr.bf16.mxu0 (!%p341_p9), %v1400_v2  ;;  %v1409_v8 = vld [vmem:[%s2030_s1 + $0x44] ss:$8 sps:$4 sm:$0xff] (!%p341_p9)   ;;  %v1411_v9 = vld [vmem:[%s2030_s1 + $0x40] ss:$8 sps:$4 sm:$0xff] (!%p341_p9)   ;;  %v1412_v10 = vld [vmem:[%s2030_s1 + $0x54] ss:$8 sps:$4 sm:$0xff] (!%p341_p9)  }
  0x13   : > { %v1414_v11 = vld [vmem:[%s2030_s1 + $0x50] ss:$8 sps:$4 sm:$0xff] (!%p341_p9)   ;;  %v1415_v12 = vld [vmem:[%s2030_s1 + $0x64] ss:$8 sps:$4 sm:$0xff] (!%p341_p9)   ;;  %v1417_v13 = vld [vmem:[%s2030_s1 + $0x60] ss:$8 sps:$4 sm:$0xff] (!%p341_p9)  }
  0x14   : > { %v1418_v15 = vld [vmem:[%s2030_s1 + $0x74] ss:$8 sps:$4 sm:$0xff] (!%p341_p9)   ;;  %v1420_v17 = vld [vmem:[%s2030_s1 + $0x70] ss:$8 sps:$4 sm:$0xff] (!%p341_p9)   ;;  %v1421_v18 = vld [vmem:[%s2030_s1 + $0x84] ss:$8 sps:$4 sm:$0xff] (!%p341_p9)  }
  0x15   : > { %601 = vmatpush1.bf16.msra.mxu0 (!%p341_p9), %v1402_v3  ;;  %v1423_v19 = vld [vmem:[%s2030_s1 + $0x80] ss:$8 sps:$4 sm:$0xff] (!%p341_p9)   ;;  %v1424_v20 = vld [vmem:[%s2030_s1 + $0x94] ss:$8 sps:$4 sm:$0xff] (!%p341_p9)   ;;  %v1426_v21 = vld [vmem:[%s2030_s1 + $0x90] ss:$8 sps:$4 sm:$0xff] (!%p341_p9)  }
  0x16   : > { %602 = vmatprep.subr.bf16.mxu0 (!%p341_p9), %v1403_v4  ;;  %v1427_v22 = vld [vmem:[%s2030_s1 + $0xa4] ss:$8 sps:$4 sm:$0xff] (!%p341_p9)   ;;  %v1429_v23 = vld [vmem:[%s2030_s1 + $0xa0] ss:$8 sps:$4 sm:$0xff] (!%p341_p9)   ;;  %v1430_v24 = vld [vmem:[%s2030_s1 + $0xb4] ss:$8 sps:$4 sm:$0xff] (!%p341_p9)  }
  0x17   : > { %s381_s16 = scalar_select %p380_p10, %s1661_s21, 1  ;;  %v1432_v25 = vld [vmem:[%s2030_s1 + $0xb0] ss:$8 sps:$4 sm:$0xff]   ;;  %v1433_v26 = vld [vmem:[%s2030_s1 + $0xc4] ss:$8 sps:$4 sm:$0xff]   ;;  %v422_v52 = vshrl.u32 %v421_v51, 7 }
  0x18   : > { %v1435_v27 = vld [vmem:[%s2030_s1 + $0xc0] ss:$8 sps:$4 sm:$0xff]   ;;  %v1436_v28 = vld [vmem:[%s2030_s1 + $0xd4] ss:$8 sps:$4 sm:$0xff]   ;;  %v1438_v29 = vld [vmem:[%s2030_s1 + $0xd0] ss:$8 sps:$4 sm:$0xff]  }
  0x19   : > { %603 = vmatpush1.bf16.msra.mxu0 %v1405_v5  ;;  %s1335_s30 = sshll.u32 %s381_s16, 3  ;;  %v1439_v30 = vld [vmem:[%s2030_s1 + $0xe4] ss:$8 sps:$4 sm:$0xff]   ;;  %v1441_v31 = vld [vmem:[%s2030_s1 + $0xe0] ss:$8 sps:$4 sm:$0xff]   ;;  %v1837_v53 = vsub.s32 0, %v422_v52 }
  0x1a   : > { %604 = vmatprep.subr.bf16.mxu0 %v1406_v6  ;;  %s384_s15 = scalar_lea.vmem %s2029_s0, %s1335_s30  ;;  %v1442_v32 = vld [vmem:[%s2030_s1 + $0xf4] ss:$8 sps:$4 sm:$0xff]   ;;  %v1444_v33 = vld [vmem:[%s2030_s1 + $0xf0] ss:$8 sps:$4 sm:$0xff]   ;;  %v1447_v35 = vld [vmem:[%s2034_s5 + $0x4] ss:$8 sps:$4 sm:$0xff]  }
  0x1b   : > { %v386_v14 = vld [vmem:[%s384_s15] sm:$0xff]  ;;  %v1450_v37 = vld [vmem:[%s2034_s5 + $0x14] ss:$8 sps:$4 sm:$0xff]   ;;  %897 = vmatprep.subr.bf16.mxu1 %v1447_v35  ;;  %v1452_v38 = vld [vmem:[%s2034_s5 + $0x10] ss:$8 sps:$4 sm:$0xff]   ;;  %v1842_v55 = vsub.s32 1, %v422_v52 }
  0x1c   : > { %v1249_v16 = vcombine.high %v386_v14, %v386_v14  ;;  %v1248_v34 = vcombine.low %v386_v14, %v386_v14  ;;  %v1449_v36 = vld [vmem:[%s2034_s5] ss:$8 sps:$4 sm:$0xff]   ;;  %v1453_v39 = vld [vmem:[%s2034_s5 + $0x24] ss:$8 sps:$4 sm:$0xff]   ;;  %v1456_v41 = vld [vmem:[%s2034_s5 + $0x34] ss:$8 sps:$4 sm:$0xff]  }
  0x1d   : > { %605 = vmatpush1.bf16.msra.mxu0 %v1408_v7  ;;  %898 = vmatpush1.bf16.msra.mxu1 %v1449_v36  ;;  %v1455_v40 = vld [vmem:[%s2034_s5 + $0x20] ss:$8 sps:$4 sm:$0xff]   ;;  %v1458_v42 = vld [vmem:[%s2034_s5 + $0x30] ss:$8 sps:$4 sm:$0xff]   ;;  %v1459_v43 = vld [vmem:[%s2034_s5 + $0x44] ss:$8 sps:$4 sm:$0xff]  }
  0x1e   : > { %606 = vmatprep.subr.bf16.mxu0 %v1409_v8  ;;  %630 = vmatprep.mubr.bf16.mxu0 %v1249_v16  ;;  %v1461_v44 = vld [vmem:[%s2034_s5 + $0x40] ss:$8 sps:$4 sm:$0xff]   ;;  %v1462_v45 = vld [vmem:[%s2034_s5 + $0x54] ss:$8 sps:$4 sm:$0xff]   ;;  %v1464_v46 = vld [vmem:[%s2034_s5 + $0x50] ss:$8 sps:$4 sm:$0xff]  }
  0x1f   : > { %899 = vmatprep.subr.bf16.mxu1 %v1450_v37  ;;  %v1465_v47 = vld [vmem:[%s2034_s5 + $0x64] ss:$8 sps:$4 sm:$0xff]   ;;  %v1467_v48 = vld [vmem:[%s2034_s5 + $0x60] ss:$8 sps:$4 sm:$0xff]   ;;  %v1468_v49 = vld [vmem:[%s2034_s5 + $0x74] ss:$8 sps:$4 sm:$0xff]  }
  0x20   : > { %v1470_v50 = vld [vmem:[%s2034_s5 + $0x70] ss:$8 sps:$4 sm:$0xff]   ;;  %v419_v54 = vld [vmem:[%s2031_s2] sm:$0x3]  ;;  %v1471_v4 = vld [vmem:[%s2034_s5 + $0x84] ss:$8 sps:$4 sm:$0xff]  }
  0x21   : > { %607 = vmatpush1.bf16.msra.mxu0 %v1411_v9  ;;  %900 = vmatpush1.bf16.msra.mxu1 %v1452_v38  ;;  %v424_v56 = vrot.slane %v419_v54, %v1837_v53  ;;  %v428_v57 = vrot.slane %v419_v54, %v1842_v55  ;;  %v1473_v5 = vld [vmem:[%s2034_s5 + $0x80] ss:$8 sps:$4 sm:$0xff]   ;;  %v1474_v6 = vld [vmem:[%s2034_s5 + $0x94] ss:$8 sps:$4 sm:$0xff]   ;;  %v1476_v7 = vld [vmem:[%s2034_s5 + $0x90] ss:$8 sps:$4 sm:$0xff]  }
  0x22   : > { %608 = vmatprep.subr.bf16.mxu0 %v1412_v10  ;;  %901 = vmatprep.subr.bf16.mxu1 %v1453_v39  ;;  %v1477_v8 = vld [vmem:[%s2034_s5 + $0xa4] ss:$8 sps:$4 sm:$0xff]   ;;  %v1479_v9 = vld [vmem:[%s2034_s5 + $0xa0] ss:$8 sps:$4 sm:$0xff]   ;;  %v1480_v10 = vld [vmem:[%s2034_s5 + $0xb4] ss:$8 sps:$4 sm:$0xff]  }
  0x23   : > { %v1486_v14 = vld [vmem:[%s2034_s5 + $0xd4] ss:$8 sps:$4 sm:$0xff]   ;;  %v1489_v16 = vld [vmem:[%s2034_s5 + $0xe4] ss:$8 sps:$4 sm:$0xff]   ;;  %s377_s12 = sand.u32 1, %s1569_s18   ;;  %s1332_s30 = sshll.u32 %s1661_s21, 7 }
  0x24   : > { %s1245_s19 = sshll.u32 %s377_s12, 3  ;;  %s1987_s24 = scalar_lea.hbm %s2040_s11, %s1332_s30 }
  0x25   : > { %609 = vmatpush1.bf16.msra.mxu0 %v1414_v11  ;;  %902 = vmatpush1.bf16.msra.mxu1 %v1455_v40  ;;  %v1482_v11 = vld [vmem:[%s2034_s5 + $0xb0] ss:$8 sps:$4 sm:$0xff]   ;;  %s379_s13 = scalar_lea.vmem [#allocation2], %s1245_s19  ;;  %s1169_s16 = scalar_lea.sflag [#allocation3], %s377_s12 }
  0x26   : > { %610 = vmatprep.subr.bf16.mxu0 %v1415_v12  ;;  %903 = vmatprep.subr.bf16.mxu1 %v1456_v41  ;;  %v1483_v12 = vld [vmem:[%s2034_s5 + $0xc4] ss:$8 sps:$4 sm:$0xff]   ;;  %s1182_s14 = sshll.u32 %s379_s13, 4  ;;  %s1579_s21 = smov [#allocation2]   ;;  %s1989_s14 = int_to_ptr.vmem [resolvable:$true] %s1182_s14 }
  0x27   : > { %s1515_s25 = scalar_lea.vmem %s1989_s14, 128  ;;  %s1519_s29 = sshll.u32 %s1579_s21, 4  ;;  %s1520_s29 = int_to_ptr.vmem [resolvable:$false] %s1519_s29 }
  0x28   : > { %p1516_p11 = scmp.ne.s32.totalorder %s1989_s14, %s1515_s25  ;;  %s1521_s19 = scalar_lea.vmem %s1520_s29, 256 }
  0x29   : > { %611 = vmatpush1.bf16.msra.mxu0 %v1417_v13  ;;  %904 = vmatpush1.bf16.msra.mxu1 %v1458_v42  ;;  %v1485_v13 = vld [vmem:[%s2034_s5 + $0xc0] ss:$8 sps:$4 sm:$0xff]   ;;  %p1522_p0 = scmp.lt.s32.totalorder %s1989_s14, %s1520_s29  ;;  %p1523_p1 = scmp.lt.s32.totalorder %s1521_s19, %s1515_s25 }
  0x2a   : > { %612 = vmatprep.subr.bf16.mxu0 %v1418_v15  ;;  %905 = vmatprep.subr.bf16.mxu1 %v1459_v43  ;;  %v1488_v15 = vld [vmem:[%s2034_s5 + $0xd0] ss:$8 sps:$4 sm:$0xff]   ;;  %p1517_p12 = pnand %p1516_p11, %p1678_p5 }
  0x2b   : > { %p1524_p2 = por %p1523_p1, %p1522_p0 }
  0x2c   : > { %p1518_p13 = pneg %p1517_p12 }
  0x2d   : > { %613 = vmatpush1.bf16.msra.mxu0 %v1420_v17  ;;  %906 = vmatpush1.bf16.msra.mxu1 %v1461_v44  ;;  %v1491_v17 = vld [vmem:[%s2034_s5 + $0xe0] ss:$8 sps:$4 sm:$0xff]  }
  0x2e   : > { %614 = vmatprep.subr.bf16.mxu0 %v1421_v18  ;;  %907 = vmatprep.subr.bf16.mxu1 %v1462_v45  ;;  %v1492_v18 = vld [vmem:[%s2034_s5 + $0xf4] ss:$8 sps:$4 sm:$0xff]   ;;  %p1525_p3 = pnand %p1524_p2, %p1518_p13 }
  0x31   : > { %615 = vmatpush1.bf16.msra.mxu0 %v1423_v19  ;;  %908 = vmatpush1.bf16.msra.mxu1 %v1464_v46  ;;  %v1494_v19 = vld [vmem:[%s2034_s5 + $0xf0] ss:$8 sps:$4 sm:$0xff]  }
  0x32   : > { %616 = vmatprep.subr.bf16.mxu0 %v1424_v20  ;;  %909 = vmatprep.subr.bf16.mxu1 %v1465_v47 }
  0x35   : > { %617 = vmatpush1.bf16.msra.mxu0 %v1426_v21  ;;  %910 = vmatpush1.bf16.msra.mxu1 %v1467_v48  ;;  %v725_v48 = vld [vmem:[%s2035_s6] sm:$0x3] }
  0x36   : > { %618 = vmatprep.subr.bf16.mxu0 %v1427_v22  ;;  %911 = vmatprep.subr.bf16.mxu1 %v1468_v49  ;;  %v730_v49 = vrot.slane %v725_v48, %v1837_v53 }
  0x39   : > { %619 = vmatpush1.bf16.msra.mxu0 %v1429_v23  ;;  %912 = vmatpush1.bf16.msra.mxu1 %v1470_v50  ;;  %v734_v50 = vrot.slane %v725_v48, %v1842_v55 }
  0x3a   : > { %620 = vmatprep.subr.bf16.mxu0 %v1430_v24  ;;  %913 = vmatprep.subr.bf16.mxu1 %v1471_v4  ;;  %v1500_v4 = vld [vmem:[%s2038_s9 + $0x10] sm:$0xff]  }
  0x3d   : > { %621 = vmatpush1.bf16.msra.mxu0 %v1432_v25  ;;  %914 = vmatpush1.bf16.msra.mxu1 %v1473_v5  ;;  %v1501_v5 = vld [vmem:[%s2038_s9 + $0x58] sm:$0xff]  }
  0x3e   : > { %622 = vmatprep.subr.bf16.mxu0 %v1433_v26  ;;  %915 = vmatprep.subr.bf16.mxu1 %v1474_v6  ;;  %v1502_v6 = vld [vmem:[%s2038_s9 + $0x18] sm:$0xff]  }
  0x41   : > { %623 = vmatpush1.bf16.msra.mxu0 %v1435_v27  ;;  %916 = vmatpush1.bf16.msra.mxu1 %v1476_v7  ;;  %v655_v27 = vld [vmem:[%s2032_s3] sm:$0x3] }
  0x42   : > { %624 = vmatprep.subr.bf16.mxu0 %v1436_v28  ;;  %917 = vmatprep.subr.bf16.mxu1 %v1477_v8  ;;  %v660_v28 = vrot.slane %v655_v27, %v1837_v53  ;;  %v1503_v7 = vld [vmem:[%s2038_s9 + $0x60] sm:$0xff]  }
  0x43   : > { %v1504_v8 = vld [vmem:[%s2038_s9 + $0x20] sm:$0xff]  }
  0x45   : > { %625 = vmatpush1.bf16.msra.mxu0 %v1438_v29  ;;  %918 = vmatpush1.bf16.msra.mxu1 %v1479_v9  ;;  %v664_v29 = vrot.slane %v655_v27, %v1842_v55  ;;  %v1505_v9 = vld [vmem:[%s2038_s9 + $0x68] sm:$0xff]  }
  0x46   : > { %626 = vmatprep.subr.bf16.mxu0 %v1439_v30  ;;  %919 = vmatprep.subr.bf16.mxu1 %v1480_v10  ;;  %v671_v30 = vld [vmem:[%s2033_s4] sm:$0x3]  ;;  %v1506_v10 = vld [vmem:[%s2038_s9 + $0x28] sm:$0xff]  }
  0x49   : > { %627 = vmatpush1.bf16.msra.mxu0 %v1441_v31  ;;  %920 = vmatpush1.bf16.msra.mxu1 %v1482_v11  ;;  %v1507_v11 = vld [vmem:[%s2038_s9 + $0x70] sm:$0xff]  }
  0x4a   : > { %628 = vmatprep.subr.bf16.mxu0 %v1442_v32  ;;  %921 = vmatprep.subr.bf16.mxu1 %v1483_v12  ;;  %v676_v32 = vrot.slane %v671_v30, %v1837_v53  ;;  %v1508_v12 = vld [vmem:[%s2038_s9 + $0x30] sm:$0xff]  }
  0x4d   : > { %629 = vmatpush1.bf16.msra.mxu0 %v1444_v33  ;;  %922 = vmatpush1.bf16.msra.mxu1 %v1485_v13  ;;  %v680_v33 = vrot.slane %v671_v30, %v1842_v55  ;;  %v1509_v13 = vld [vmem:[%s2038_s9 + $0x78] sm:$0xff]  }
  0x4e   : > { %923 = vmatprep.subr.bf16.mxu1 %v1486_v14  ;;  %v1510_v14 = vld [vmem:[%s2038_s9 + $0x38] sm:$0xff]  }
  0x50   : > { %631 = vmatmul.mubr.bf16.vlgmr.msra.gmra.mrb[0].mxu0 %v1248_v34 }
  0x51   : > { %924 = vmatpush1.bf16.msra.mxu1 %v1488_v15 }
  0x52   : > { %925 = vmatprep.subr.bf16.mxu1 %v1489_v16 }
  0x55   : > { %926 = vmatpush1.bf16.msra.mxu1 %v1491_v17 }
  0x56   : > { %927 = vmatprep.subr.bf16.mxu1 %v1492_v18 }
  0x59   : > { %928 = vmatpush1.bf16.msra.mxu1 %v1494_v19 }
 0x123   : > { %v632_v58 = vpop.f32.mrb[0].mxu0 }
 0x124   : > { %v1846_v59 = vadd.f32 %v632_v58, %v424_v56  ;;  %v634_v60 = vpop.f32.mrb[1].mxu0 }
 0x125   : > { %v635_v61 = vadd.f32 %v634_v60, %v428_v57  ;;  %v636_v62 = vpop.f32.mrb[2].mxu0 }
 0x126   : > { %v637_v63 = vpop.f32.mrb[3].mxu0  ;;  %v642_v1 = vmul.f32 %v1846_v59, %v1846_v59 }
 0x127   : > { %v639_v0 = vadd.f32 %v635_v61, %v1846_v59  ;;  %v643_v2 = vmul.f32 %v635_v61, %v635_v61  ;;  %v1495_v63 = vld [vmem:[%s2038_s9 + $0x40] sm:$0xff]  }
 0x128   : > { %1336 = vmatprep.subr.bf16.mxu0 %v1495_v63 }
 0x129   : > { %640 = vadd.xlane.f32.xlu0 %v639_v0  ;;  %v644_v3 = vadd.f32 %v643_v2, %v642_v1  ;;  %v1496_v0 = vld [vmem:[%s2038_s9] sm:$0xff]   ;;  %v1497_v1 = vld [vmem:[%s2038_s9 + $0x48] sm:$0xff]  }
 0x12a   : > { %1337 = vmatpush3.bf16.msra.mxu0 %v1496_v0  ;;  %v1498_v2 = vld [vmem:[%s2038_s9 + $0x8] sm:$0xff]  }
 0x12b   : > { %1338 = vmatprep.subr.bf16.mxu0 %v1497_v1 }
 0x12d   : > { %645 = vadd.xlane.f32.xlu0 %v644_v3  ;;  %v1499_v3 = vld [vmem:[%s2038_s9 + $0x50] sm:$0xff]  }
 0x12e   : > { %1339 = vmatpush3.bf16.msra.mxu0 %v1498_v2 }
 0x12f   : > { %1340 = vmatprep.subr.bf16.mxu0 %v1499_v3 }
 0x132   : > { %1341 = vmatpush3.bf16.msra.mxu0 %v1500_v4 }
 0x133   : > { %1342 = vmatprep.subr.bf16.mxu0 %v1501_v5 }
 0x136   : > { %1343 = vmatpush3.bf16.msra.mxu0 %v1502_v6 }
 0x137   : > { %1344 = vmatprep.subr.bf16.mxu0 %v1503_v7 }
 0x13a   : > { %1345 = vmatpush3.bf16.msra.mxu0 %v1504_v8 }
 0x13b   : > { %1346 = vmatprep.subr.bf16.mxu0 %v1505_v9 }
 0x13e   : > { %1347 = vmatpush3.bf16.msra.mxu0 %v1506_v10 }
 0x13f   : > { %1348 = vmatprep.subr.bf16.mxu0 %v1507_v11 }
 0x142   : > { %1349 = vmatpush3.bf16.msra.mxu0 %v1508_v12 }
 0x143   : > { %1350 = vmatprep.subr.bf16.mxu0 %v1509_v13 }
 0x146   : > { %1351 = vmatpush3.bf16.msra.mxu0 %v1510_v14 }
 0x1b6   : > { %v641_v20 = vpop.xlane.xlu0 %640 }
 0x1b7   : > { %v647_v21 = vmul.f32 0.00390625, %v641_v20 }
 0x1b9   : > { %v649_v23 = vmul.f32 %v647_v21, %v647_v21  ;;  %v653_v34 = vsub.f32 %v1846_v59, %v647_v21  ;;  %v654_v35 = vsub.f32 %v635_v61, %v647_v21 }
 0x1ba   : > { %v646_v22 = vpop.xlane.xlu0 %645 }
 0x1bb   : > { %v648_v24 = vmul.f32 0.00390625, %v646_v22  ;;  %v954_v22 = vld [vmem:[%s2036_s7] sm:$0x3] }
 0x1bd   : > { %v650_v25 = vsub.f32 %v648_v24, %v649_v23  ;;  %v959_v23 = vrot.slane %v954_v22, %v1837_v53  ;;  %v963_v24 = vrot.slane %v954_v22, %v1842_v55 }
 0x1bf   : > { %v651_v26 = vadd.f32 1e-05, %v650_v25  ;;  %v970_v25 = vld [vmem:[%s2037_s8] sm:$0x3] }
 0x1c0   : > { %v975_v27 = vrot.slane %v970_v25, %v1837_v53 }
 0x1c1   : > { %1511 = vrsqrt.f32 %v651_v26 }
 0x1cb   : > { %v1512_v31 = vpop.eup %1511 }
 0x1cc   : > { %v668_v36 = vmul.f32 %v1512_v31, %v664_v29  ;;  %v667_v37 = vmul.f32 %v1512_v31, %v660_v28  ;;  %v979_v28 = vrot.slane %v970_v25, %v1842_v55 }
 0x1ce   : > { %v670_v38 = vmul.f32 %v668_v36, %v654_v35  ;;  %v669_v39 = vmul.f32 %v667_v37, %v653_v34 }
 0x1d0   : > { %v684_v40 = vadd.f32 %v680_v33, %v670_v38  ;;  %v683_v41 = vadd.f32 %v676_v32, %v669_v39 }
 0x1d2   : > { %vm686_vm0 = vcmp.ge.f32.partialorder %v684_v40, 0.0  ;;  %v688_v42 = vmul.f32 0.2, %v684_v40  ;;  %vm685_vm1 = vcmp.ge.f32.partialorder %v683_v41, 0.0  ;;  %v687_v43 = vmul.f32 0.2, %v683_v41 }
 0x1d4   : > { %v690_v44 = vsel %vm686_vm0, %v684_v40, %v688_v42  ;;  %v689_v45 = vsel %vm685_vm1, %v683_v41, %v687_v43  ;;  %v1314_v42 = vld [vmem:[%s2039_s10] ss:$0 sm:$0xff] }
 0x1d5   : > { %v692_v46 = vpack.c.bf16 %v690_v44, %v690_v44  ;;  %v691_v47 = vpack.c.bf16 %v689_v45, %v689_v45 }
 0x1d7   : > { %929 = vmatprep.mubr.bf16.mxu1 %v692_v46 }
 0x1d8   : > { %930 = vmatmul.mubr.bf16.vlgmr.msra.gmra.mrb[0].mxu1 %v691_v47 }
 0x2ab   : > { %v931_v51 = vpop.f32.mrb[0].mxu1 }
 0x2ac   : > { %v1915_v52 = vadd.f32 %v931_v51, %v730_v49  ;;  %v933_v54 = vpop.f32.mrb[1].mxu1 }
 0x2ad   : > { %v934_v56 = vadd.f32 %v933_v54, %v734_v50  ;;  %v935_v57 = vpop.f32.mrb[2].mxu1 }
 0x2ae   : > { %v936_v58 = vpop.f32.mrb[3].mxu1  ;;  %v941_v60 = vmul.f32 %v1915_v52, %v1915_v52 }
 0x2af   : > { %v938_v59 = vadd.f32 %v934_v56, %v1915_v52  ;;  %v942_v61 = vmul.f32 %v934_v56, %v934_v56 }
 0x2b1   : > { %939 = vadd.xlane.f32.xlu1 %v938_v59  ;;  %v943_v62 = vadd.f32 %v942_v61, %v941_v60 }
 0x2b5   : > { %944 = vadd.xlane.f32.xlu1 %v943_v62 }
 0x33e   : > { %v940_v15 = vpop.xlane.xlu1 %939 }
 0x33f   : > { %v946_v16 = vmul.f32 0.00390625, %v940_v15 }
 0x341   : > { %v948_v18 = vmul.f32 %v946_v16, %v946_v16  ;;  %v952_v29 = vsub.f32 %v1915_v52, %v946_v16  ;;  %v953_v30 = vsub.f32 %v934_v56, %v946_v16 }
 0x342   : > { %v945_v17 = vpop.xlane.xlu1 %944 }
 0x343   : > { %v947_v19 = vmul.f32 0.00390625, %v945_v17 }
 0x345   : > { %v949_v20 = vsub.f32 %v947_v19, %v948_v18 }
 0x347   : > { %v950_v21 = vadd.f32 1e-05, %v949_v20 }
 0x349   : > { %1513 = vrsqrt.f32 %v950_v21 }
 0x353   : > { %v1514_v26 = vpop.eup %1513 }
 0x354   : > { %v966_v31 = vmul.f32 %v1514_v26, %v959_v23  ;;  %v967_v32 = vmul.f32 %v1514_v26, %v963_v24 }
 0x356   : > { %v969_v33 = vmul.f32 %v967_v32, %v953_v30  ;;  %v968_v34 = vmul.f32 %v966_v31, %v952_v29 }
 0x358   : > { %v983_v35 = vadd.f32 %v979_v28, %v969_v33  ;;  %v982_v36 = vadd.f32 %v975_v27, %v968_v34 }
 0x35a   : > { %vm985_vm2 = vcmp.ge.f32.partialorder %v983_v35, 0.0  ;;  %v987_v37 = vmul.f32 0.2, %v983_v35  ;;  %vm984_vm3 = vcmp.ge.f32.partialorder %v982_v36, 0.0  ;;  %v986_v38 = vmul.f32 0.2, %v982_v36 }
 0x35c   : > { %v989_v39 = vsel %vm985_vm2, %v983_v35, %v987_v37  ;;  %v988_v40 = vsel %vm984_vm3, %v982_v36, %v986_v38 }
 0x35d   : > { %v991_v53 = vpack.c.bf16 %v989_v39, %v989_v39  ;;  %v990_v41 = vpack.c.bf16 %v988_v40, %v988_v40 }
 0x35f   : > { %1159 = vmatprep.mubr.bf16.mxu0 %v991_v53 }
 0x360   : > { %1160 = vmatmul.mubr.bf16.vlgmr.msra.gmra.mrb[4].mxu0 %v990_v41 }
 0x433   : > { %v1352_v55 = vpop.f32.mrb[4].mxu0 }
 0x434   : > { %v1353_v43 = vpop.f32.mrb[5].mxu0 }
 0x435   : > { %v1354_v44 = vadd.f32 %v1353_v43, %v1352_v55  ;;  %v1355_v45 = vpop.f32.mrb[6].mxu0 }
 0x436   : > { %v1356_v46 = vpop.f32.mrb[7].mxu0 }
 0x437   : > { %v1162_v47 = vadd.f32 %v1354_v44, %v1314_v42 }
 0x439   : > { %1167 = vst [vmem:[%s379_s13] sm:$0xff] %v1162_v47 }
 0x43a   : > { %1528 = shalt.err (!%p1525_p3)
}
 0x43b   : > { %s1529_s12 = scalar_lea.hbm %s1987_s24, 128  ;;  %s1533_s30 = scalar_lea.hbm %s2040_s11, 256 }
 0x43c   : > { %p1530_p4 = scmp.ne.s32.totalorder %s1987_s24, %s1529_s12  ;;  %p1534_p9 = scmp.lt.u32.totalorder %s1987_s24, %s2040_s11 }
 0x43d   : > { %p1535_p10 = scmp.lt.u32.totalorder %s1533_s30, %s1529_s12  ;;  %p1537_p12 = scmp.lt.u32.totalorder %s1529_s12, %s1987_s24 }
 0x43e   : > { %p1531_p7 = pnand %p1530_p4, %p1678_p5 }
 0x43f   : > { %p1536_p11 = por %p1535_p10, %p1534_p9 }
 0x440   : > { %p1532_p8 = pneg %p1531_p7 }
 0x441   : > { %p1538_p13 = por %p1537_p12, %p1536_p11 }
 0x443   : > { %p1539_p0 = pnand %p1538_p13, %p1532_p8 }
 0x445   : > { %1542 = shalt.err (!%p1539_p0)
}
 0x446   : > { %1358 = dma.vmem_to_hbm [thread:$0]  (%p1678_p5), %s1989_s14, 128, %s1987_s24, %s1169_s16  }
 0x447 PF: > { %p1364_p1 = scmp.ge.s32.totalorder %s1577_s20, 2  ;;  %s1194_s22 = sand.u32 1, %s1565_s17  }
 0x448   : > { %s1195_s25 = scalar_lea.sflag [#allocation3], %s1194_s22 }
 0x449   : > { %p1361_p2 = pnand %p1364_p1, %p1682_p6 }
 0x44b   : > { %1560 = dma.done.wait (!%p1361_p2), %s1195_s25, 128  }
 0x44c   : > { %1562 = vsyncadd (!%p1361_p2), %s1195_s25, 4294967168  ;;  %s2049_s20 = sld [smem:[#allocation6_spill]]  ;;  %s2050_s21 = sld [smem:[#allocation5_spill]] }
 0x44d   : > { %s2051_s19 = sld [smem:[#allocation7_spill]]  ;;  %s2052_s17 = smov %s1569_s18 }
 0x452   : > { %p21_p3 = scmp.ge.s32.totalorder %s2049_s20, 4   ;;  %s2053_s18 = smov %s2050_s21 }
 0x454   :  { %23 = sbr.rel (!%p21_p3) target bundleno = 3 (0x3), region = 99 }
 0x45b   :  { %1200 = vsyncpa [#allocation3], 1 }
 0x45c   :  { %1202 = vsyncpa [#allocation3 + $0x1], 1 }

</bundles_post_ra>
